<compile_context>
chip_gen: v7x
topology: tpu7x:2x2x1
jax: 0.10.0
libtpu: 0.0.40
codegen_flags: <defaults>
</compile_context>

<pallas_src>
import jax
import jax.numpy as jnp
from jax import lax
from jax.experimental import pallas as pl
from jax.experimental.pallas import tpu as pltpu


def mlp_kernel(x_ref, w1_ref, b1_ref, w2_ref, b2_ref, w3_ref, b3_ref, o_ref):
    # x_ref : (TB, F)  f32  streamed per grid step
    # w1_ref: (F, 64)  f32  VMEM-resident   b1_ref: (1, 64) f32
    # w2_ref: (64, 32) f32                  b2_ref: (1, 32) f32
    # w3_ref: (1, 32)  f32  (PyTorch (32,1) weight stored as a row)
    # b3_ref: (1, 1)   f32
    # o_ref : (1, TB)  f32  lane-dense output row (batch along lanes)
    x = x_ref[...]

    # Layer 1: (TB, F) @ (F, 64) -> (TB, 64), bias + ReLU on the VPU.
    h1 = jnp.dot(x, w1_ref[...], preferred_element_type=jnp.float32) + b1_ref[...]
    h1 = jnp.maximum(h1, 0.0)

    # Layer 2: (TB, 64) @ (64, 32) -> (TB, 32).
    h2 = jnp.dot(h1, w2_ref[...], preferred_element_type=jnp.float32) + b2_ref[...]
    h2 = jnp.maximum(h2, 0.0)

    # Layer 3 (32 -> 1) as an NT matmul (contract the last dim of both operands),
    # the same pattern as attention's q @ k^T: (1,32) x (TB,32)^T -> (1, TB).
    # The result is already batch-on-lanes, so the store is lane-dense.
    out_row = lax.dot_general(
        w3_ref[...], h2,
        dimension_numbers=(((1,), (1,)), ((), ())),
        preferred_element_type=jnp.float32,
    ) + b3_ref[...]

    o_ref[...] = out_row.astype(o_ref.dtype)


def _mlp_tiles(x, params, *, tile, n_blocks):
    """Run the fused MLP kernel over the first `n_blocks * tile` rows of x.

    `x` may have more rows than `n_blocks * tile`; extra rows are simply never
    touched by the grid.  Returns a flat (n_blocks * tile,) f32 vector.
    """
    rows = n_blocks * tile
    _, F = x.shape

    w1 = params["w1"].astype(jnp.float32)
    b1 = params["b1"].reshape(1, -1).astype(jnp.float32)
    w2 = params["w2"].astype(jnp.float32)
    b2 = params["b2"].reshape(1, -1).astype(jnp.float32)
    w3 = params["w3"].reshape(1, -1).astype(jnp.float32)   # (32, 1) -> (1, 32)
    b3 = params["b3"].reshape(1, 1).astype(jnp.float32)

    # Weights/biases: constant block index -> stay resident in VMEM for the grid.
    resident = lambda arr: pl.BlockSpec(arr.shape, lambda i: (0, 0))

    param_bytes = sum(int(a.size) * 4 for a in (w1, b1, w2, b2, w3, b3))
    cost = pl.CostEstimate(
        flops=2 * rows * (F * 64 + 64 * 32 + 32),
        transcendentals=0,
        bytes_accessed=rows * F * 4 + rows * 4 + param_bytes,
    )

    out = pl.pallas_call(
        mlp_kernel,
        out_shape=jax.ShapeDtypeStruct((n_blocks, tile), jnp.float32),
        grid=(n_blocks,),
        in_specs=[
            pl.BlockSpec((tile, F), lambda i: (i, 0)),   # x: streamed batch tile
            resident(w1), resident(b1),
            resident(w2), resident(b2),
            resident(w3), resident(b3),
        ],
        out_specs=pl.BlockSpec((1, tile), lambda i: (i, 0)),   # lane-dense row
        compiler_params=pltpu.CompilerParams(
            # On v7x, confirm this actually shards the batch grid across both
            # TensorCores; use pltpu.CORE_PARALLEL here if it does not.
            dimension_semantics=("parallel",),
            vmem_limit_bytes=32 * 1024 * 1024,
        ),
        cost_estimate=cost,
    )(x, w1, b1, w2, b2, w3, b3)

    return out.reshape(rows)


def stock_price_model(x, params, *, max_tile=8192):
    """Forward pass. x: (B, input_size) float32 -> (B, 1) float32."""
    B, _ = x.shape
    x = x.astype(jnp.float32)

    if B <= max_tile:
        # Single exact-shape block (legal via the "equals full dim" exemption).
        return _mlp_tiles(x, params, tile=B, n_blocks=1).reshape(B, 1)

    tile = max(8, (max_tile // 8) * 8)       # sublane-aligned batch tile
    n_full = B // tile
    flat = _mlp_tiles(x, params, tile=tile, n_blocks=n_full)

    rem = B - n_full * tile
    if rem:
        # Ragged tail: one extra single-block call on the leftover rows.
        # No full-array pad copy, no out-of-bounds boundary blocks.
        tail = _mlp_tiles(x[n_full * tile:], params, tile=rem, n_blocks=1)
        flat = jnp.concatenate([flat, tail])

    return flat.reshape(B, 1)


def init_params(key, input_size):
    """PyTorch-Linear-style init U(-1/sqrt(fan_in), 1/sqrt(fan_in)); weights stored (in, out)."""
    dims = [(input_size, 64), (64, 32), (32, 1)]
    params = {}
    for i, (fin, fout) in enumerate(dims, start=1):
        key, kw, kb = jax.random.split(key, 3)
        bound = 1.0 / jnp.sqrt(jnp.float32(fin))
        params[f"w{i}"] = jax.random.uniform(kw, (fin, fout), jnp.float32, -bound, bound)
        params[f"b{i}"] = jax.random.uniform(kb, (1, fout), jnp.float32, -bound, bound)
    return params


def reference_f32(x, p):
    """Plain-JAX reference in true f32 (HIGHEST precision so XLA doesn't drop to bf16)."""
    hi = lax.Precision.HIGHEST
    h1 = jnp.maximum(jnp.dot(x, p["w1"], precision=hi) + p["b1"], 0.0)
    h2 = jnp.maximum(jnp.dot(h1, p["w2"], precision=hi) + p["b2"], 0.0)
    return jnp.dot(h2, p["w3"], precision=hi) + p["b3"]


if __name__ == "__main__":
    key = jax.random.PRNGKey(0)
    batch, input_size = 8, 32

    key, kx = jax.random.split(key)
    x = jax.random.normal(kx, (batch, input_size), jnp.float32)
    params = init_params(key, input_size)

    # Small case: single exact-shape block.
    out = jax.block_until_ready(stock_price_model(x, params))
    assert out.shape == (batch, 1), out.shape
    ref = reference_f32(x, params)
    assert jnp.allclose(out, ref, atol=1e-3, rtol=1e-3), \
        float(jnp.max(jnp.abs(out - ref)))

    # Larger, non-multiple batch: multi-step grid (3 x 256 rows) plus an exact
    # 232-row tail call; exercises resident weights and the lane-dense output path.
    key, kx2 = jax.random.split(key)
    x_big = jax.random.normal(kx2, (1000, input_size), jnp.float32)
    out_big = jax.block_until_ready(stock_price_model(x_big, params, max_tile=256))
    assert out_big.shape == (1000, 1), out_big.shape
    ref_big = reference_f32(x_big, params)
    assert jnp.allclose(out_big, ref_big, atol=1e-3, rtol=1e-3), \
        float(jnp.max(jnp.abs(out_big - ref_big)))

    print("KERNEL_OK")
</pallas_src>

<mosaic_0001>
module attributes {stable_mosaic.version = 11 : i64} {
  func.func @mlp_kernel(%arg0: i32, %arg1: memref<8x32xf32, #tpu.memory_space<vmem>>, %arg2: memref<32x64xf32, #tpu.memory_space<vmem>>, %arg3: memref<1x64xf32, #tpu.memory_space<vmem>>, %arg4: memref<64x32xf32, #tpu.memory_space<vmem>>, %arg5: memref<1x32xf32, #tpu.memory_space<vmem>>, %arg6: memref<1x32xf32, #tpu.memory_space<vmem>>, %arg7: memref<1x1xf32, #tpu.memory_space<vmem>>, %arg8: memref<1x8xf32, #tpu.memory_space<vmem>>) attributes {dimension_semantics = [#tpu.dimension_semantics<parallel>], iteration_bounds = array<i64: 1>, scalar_prefetch = 0 : i64, scratch_operands = 0 : i64, tpu.core_type = #tpu.core_type<tc>, window_params = [{transform_indices = @transform_0, window_bounds = array<i64: 8, 32>}, {pipeline_mode = #tpu.pipeline_mode<synchronous>, transform_indices = @transform_1, window_bounds = array<i64: 32, 64>}, {pipeline_mode = #tpu.pipeline_mode<synchronous>, transform_indices = @transform_2, window_bounds = array<i64: 1, 64>}, {pipeline_mode = #tpu.pipeline_mode<synchronous>, transform_indices = @transform_3, window_bounds = array<i64: 64, 32>}, {pipeline_mode = #tpu.pipeline_mode<synchronous>, transform_indices = @transform_4, window_bounds = array<i64: 1, 32>}, {pipeline_mode = #tpu.pipeline_mode<synchronous>, transform_indices = @transform_5, window_bounds = array<i64: 1, 32>}, {pipeline_mode = #tpu.pipeline_mode<synchronous>, transform_indices = @transform_6, window_bounds = array<i64: 1, 1>}, {transform_indices = @transform_7, window_bounds = array<i64: 1, 8>}]} {
    %c0 = arith.constant 0 : index
    %c0_0 = arith.constant 0 : index
    %0 = vector.load %arg1[%c0, %c0_0] : memref<8x32xf32, #tpu.memory_space<vmem>>, vector<8x32xf32>
    %c0_1 = arith.constant 0 : index
    %c0_2 = arith.constant 0 : index
    %1 = vector.load %arg2[%c0_1, %c0_2] : memref<32x64xf32, #tpu.memory_space<vmem>>, vector<32x64xf32>
    %cst = arith.constant dense<0.000000e+00> : vector<8x64xf32>
    %2 = tpu.matmul %0, %1, %cst {dimension_numbers = #tpu.dot_dimension_numbers<[1], [0], [0], [1], [0, 0, 1, 1], [], []>} : vector<8x32xf32>, vector<32x64xf32>, vector<8x64xf32> -> vector<8x64xf32>
    %c0_3 = arith.constant 0 : index
    %c0_4 = arith.constant 0 : index
    %3 = vector.load %arg3[%c0_3, %c0_4] : memref<1x64xf32, #tpu.memory_space<vmem>>, vector<1x64xf32>
    %4 = vector.broadcast %3 : vector<1x64xf32> to vector<8x64xf32>
    %5 = arith.addf %2, %4 : vector<8x64xf32>
    %cst_5 = arith.constant 0.000000e+00 : f32
    %6 = vector.broadcast %cst_5 : f32 to vector<8x64xf32>
    %7 = arith.maximumf %5, %6 : vector<8x64xf32>
    %c0_6 = arith.constant 0 : index
    %c0_7 = arith.constant 0 : index
    %8 = vector.load %arg4[%c0_6, %c0_7] : memref<64x32xf32, #tpu.memory_space<vmem>>, vector<64x32xf32>
    %cst_8 = arith.constant dense<0.000000e+00> : vector<8x32xf32>
    %9 = tpu.matmul %7, %8, %cst_8 {dimension_numbers = #tpu.dot_dimension_numbers<[1], [0], [0], [1], [0, 0, 1, 1], [], []>} : vector<8x64xf32>, vector<64x32xf32>, vector<8x32xf32> -> vector<8x32xf32>
    %c0_9 = arith.constant 0 : index
    %c0_10 = arith.constant 0 : index
    %10 = vector.load %arg5[%c0_9, %c0_10] : memref<1x32xf32, #tpu.memory_space<vmem>>, vector<1x32xf32>
    %11 = vector.broadcast %10 : vector<1x32xf32> to vector<8x32xf32>
    %12 = arith.addf %9, %11 : vector<8x32xf32>
    %cst_11 = arith.constant 0.000000e+00 : f32
    %13 = vector.broadcast %cst_11 : f32 to vector<8x32xf32>
    %14 = arith.maximumf %12, %13 : vector<8x32xf32>
    %c0_12 = arith.constant 0 : index
    %c0_13 = arith.constant 0 : index
    %15 = vector.load %arg6[%c0_12, %c0_13] : memref<1x32xf32, #tpu.memory_space<vmem>>, vector<1x32xf32>
    %cst_14 = arith.constant dense<0.000000e+00> : vector<1x8xf32>
    %16 = tpu.matmul %15, %14, %cst_14 {dimension_numbers = #tpu.dot_dimension_numbers<[1], [1], [0], [0], [0, 0, 1, 0], [], []>} : vector<1x32xf32>, vector<8x32xf32>, vector<1x8xf32> -> vector<1x8xf32>
    %c0_15 = arith.constant 0 : index
    %c0_16 = arith.constant 0 : index
    %17 = vector.load %arg7[%c0_15, %c0_16] : memref<1x1xf32, #tpu.memory_space<vmem>>, vector<1x1xf32>
    %18 = vector.broadcast %17 : vector<1x1xf32> to vector<1x8xf32>
    %19 = arith.addf %16, %18 : vector<1x8xf32>
    %c0_17 = arith.constant 0 : index
    %c0_18 = arith.constant 0 : index
    %20 = vector.load %arg8[%c0_17, %c0_18] : memref<1x8xf32, #tpu.memory_space<vmem>>, vector<1x8xf32>
    tpu.vector_store %arg8[%c0_17, %c0_18], %19 {strides = array<i32>} : memref<1x8xf32, #tpu.memory_space<vmem>>, vector<1x8xf32>,
    return
  }
  func.func @transform_0(%arg0: i32) -> (i32, i32) {
    %c0_i32 = arith.constant 0 : i32
    %c0_i32_0 = arith.constant 0 : i32
    return %arg0, %c0_i32 : i32, i32
  }
  func.func @transform_1(%arg0: i32) -> (i32, i32) {
    %c0_i32 = arith.constant 0 : i32
    %c0_i32_0 = arith.constant 0 : i32
    %c0_i32_1 = arith.constant 0 : i32
    return %c0_i32, %c0_i32_0 : i32, i32
  }
  func.func @transform_2(%arg0: i32) -> (i32, i32) {
    %c0_i32 = arith.constant 0 : i32
    %c0_i32_0 = arith.constant 0 : i32
    %c0_i32_1 = arith.constant 0 : i32
    return %c0_i32, %c0_i32_0 : i32, i32
  }
  func.func @transform_3(%arg0: i32) -> (i32, i32) {
    %c0_i32 = arith.constant 0 : i32
    %c0_i32_0 = arith.constant 0 : i32
    %c0_i32_1 = arith.constant 0 : i32
    return %c0_i32, %c0_i32_0 : i32, i32
  }
  func.func @transform_4(%arg0: i32) -> (i32, i32) {
    %c0_i32 = arith.constant 0 : i32
    %c0_i32_0 = arith.constant 0 : i32
    %c0_i32_1 = arith.constant 0 : i32
    return %c0_i32, %c0_i32_0 : i32, i32
  }
  func.func @transform_5(%arg0: i32) -> (i32, i32) {
    %c0_i32 = arith.constant 0 : i32
    %c0_i32_0 = arith.constant 0 : i32
    %c0_i32_1 = arith.constant 0 : i32
    return %c0_i32, %c0_i32_0 : i32, i32
  }
  func.func @transform_6(%arg0: i32) -> (i32, i32) {
    %c0_i32 = arith.constant 0 : i32
    %c0_i32_0 = arith.constant 0 : i32
    %c0_i32_1 = arith.constant 0 : i32
    return %c0_i32, %c0_i32_0 : i32, i32
  }
  func.func @transform_7(%arg0: i32) -> (i32, i32) {
    %c0_i32 = arith.constant 0 : i32
    %c0_i32_0 = arith.constant 0 : i32
    return %arg0, %c0_i32 : i32, i32
  }
}

</mosaic_0001>

<bundles_post_ra>
// kernel: tpu_custom_call.1
= control target key start
LH: loop header
LB: loop body
LE: loop exit
PB: predicated region body
PF: predicated region fallthrough
CT: control target
= control target key end

     0   :  { %s528_s0 = inlined_call_operand.vmem [shape: f32[8,32], index: 0, kind: input, shape index: {}]   ;;  %s529_s1 = inlined_call_operand.vmem [shape: f32[32,64], index: 1, kind: input, shape index: {}]   ;;  %s530_s2 = inlined_call_operand.vmem [shape: f32[1,64], index: 2, kind: input, shape index: {}]   ;;  %s531_s3 = inlined_call_operand.vmem [shape: f32[64,32], index: 3, kind: input, shape index: {}]   ;;  %s532_s4 = inlined_call_operand.vmem [shape: f32[1,32], index: 4, kind: input, shape index: {}]   ;;  %s533_s5 = inlined_call_operand.vmem [shape: f32[1,32], index: 5, kind: input, shape index: {}]   ;;  %s534_s6 = inlined_call_operand.<no memory space> [shape: f32[1,1], index: 6, kind: input, shape index: {}]   ;;  %s535_s7 = inlined_call_operand.hbm [shape: f32[1,8], index: 7, kind: output, shape index: {}]  }
   0x1   :  { %v12_v0 = vstv %s534_s6 }
   0x2   :  { %13 = vst [vmem:[#allocation2] sm:$0x1] %v12_v0 }
   0x3   :  { %v30_v1 = vld [vmem:[%s529_s1] sm:$0xff]  ;;  %v31_v2 = vld [vmem:[%s529_s1 + $0x8] sm:$0xff]  ;;  %v32_v3 = vld [vmem:[%s529_s1 + $0x10] sm:$0xff]  ;;  %v414_v4 = vmov 0.0|0.0   ;;  %vm415_vm0 = vmmov 0   ;;  %v416_v7 = vmov 0.0  }
   0x4   :  { %366 = vmatprep.subr.bf16.mxu0 %v414_v4  ;;  %v367_v5 = vpack.c.bf16 %v31_v2, %v30_v1  ;;  %v33_v6 = vld [vmem:[%s529_s1 + $0x18] sm:$0xff]  ;;  %339 = vmatprep.mubr.msk.f32.mxu0 %vm415_vm0, %v416_v7  ;;  %v116_v8 = vld [vmem:[%s531_s3] sm:$0xff]  ;;  %v117_v9 = vld [vmem:[%s531_s3 + $0x8] sm:$0xff] }
   0x5   :  { %372 = vmatprep.subr.bf16.mxu1 %v414_v4  ;;  %v118_v10 = vld [vmem:[%s531_s3 + $0x10] sm:$0xff]  ;;  %v119_v11 = vld [vmem:[%s531_s3 + $0x18] sm:$0xff]  ;;  %358 = vmatprep.mubr.msk.f32.mxu1 %vm415_vm0, %v416_v7  ;;  %v370_v12 = vpack.c.bf16 %v33_v6, %v32_v3  ;;  %v373_v13 = vpack.c.bf16 %v117_v9, %v116_v8 }
   0x6   :  { %368 = vmatpush3.bf16.msra.mxu0 %v367_v5 }
   0x7   :  { %369 = vmatprep.subr.bf16.mxu0 %v414_v4 }
   0x8   :  { %14 = vsyncpa [#allocation4], 0  ;;  %374 = vmatpush3.bf16.msra.mxu1 %v373_v13  ;;  %v376_v14 = vpack.c.bf16 %v119_v11, %v118_v10  ;;  %v120_v15 = vld [vmem:[%s531_s3 + $0x20] sm:$0xff]  ;;  %v121_v16 = vld [vmem:[%s531_s3 + $0x28] sm:$0xff]  ;;  %vm41_vm1 = vcmask 261120   ;;  %vm131_vm2 = vcmask 523264   ;;  %v213_v35 = vlaneseq }
   0x9   :  { %375 = vmatprep.subr.bf16.mxu1 %v414_v4  ;;  %v29_v17 = vld [vmem:[%s528_s0] sm:$0xff]  ;;  %v379_v18 = vpack.c.bf16 %v121_v16, %v120_v15  ;;  %v122_v19 = vld [vmem:[%s531_s3 + $0x30] sm:$0xff]  ;;  %v123_v20 = vld [vmem:[%s531_s3 + $0x38] sm:$0xff]  ;;  %v417_v28 = vmov 0   ;;  %s418_s30 = smov [#allocation3]   ;;  %vm293_vm3 = vcmask 57344  }
   0xa   :  { %371 = vmatpush3.bf16.msra.mxu0 %v370_v12  ;;  %v382_v21 = vpack.c.bf16 %v123_v20, %v122_v19  ;;  %v309_v22 = vld [vmem:[%s530_s2] ss:$0 sm:$0xff]  ;;  %389 = vset.pattern.permute.xlu0 %v417_v28  ;;  %v214_v36 = vshrl.u32 %v213_v35, 7  ;;  %s301_s8 = sshll.u32 %s418_s30, 4  ;;  %s302_s8 = int_to_ptr.vmem [resolvable:$true] %s301_s8 }
   0xb   :  { %361 = vmatprep.subr.mxu0 %v416_v7  ;;  %v207_v27 = vld [vmem:[#allocation2] sm:$0x1]  ;;  %s394_s9 = scalar_lea.vmem %s302_s8, 32  ;;  %p395_p1 = scmp.lt.s32.totalorder %s302_s8, %s302_s8 }
   0xc   :  { %377 = vmatpush3.bf16.msra.mxu1 %v376_v14  ;;  %210 = vperm.xlu0 %389, %v207_v27   ;;  %v311_v29 = vld [vmem:[%s532_s4] ss:$0 sm:$0xff]  ;;  %v215_v37 = vsub.s32 0, %v214_v36  ;;  %s390_s4 = scalar_lea.vmem %s302_s8, 16 }
   0xd   :  { %340 = vmatmul.mubr.msk.f32.vlgmr.msra.gmra.mrb[0].mxu0 %vm41_vm1, %v29_v17  ;;  %378 = vmatprep.subr.bf16.mxu1 %v414_v4  ;;  %v206_v34 = vld [vmem:[%s533_s5] sm:$0x1]  ;;  %p391_p0 = scmp.ne.s32.totalorder %s302_s8, %s390_s4  ;;  %p396_p2 = scmp.lt.s32.totalorder %s394_s9, %s390_s4 }
   0xe   :  { %363 = vmatprep.mubr.msk.f32.mxu0 %vm415_vm0, %v416_v7 }
   0xf   :  { %p397_p3 = por %p396_p2, %p395_p1 }
  0x10   :  { %380 = vmatpush3.bf16.msra.mxu1 %v379_v18 }
  0x11   :  { %381 = vmatprep.subr.bf16.mxu1 %v414_v4  ;;  %p398_p4 = pnand %p397_p3, %p391_p0 }
  0x14   :  { %383 = vmatpush3.bf16.msra.mxu1 %v382_v21 }
  0x8b   :  { %v211_v38 = vpop.permute.xlu0 %210 }
  0x8c   :  { %v216_v39 = vrot.slane %v211_v38, %v215_v37 }
  0xe0   :  { %v111_v23 = vpop.f32.mrb[0].mxu0 }
  0xe1   :  { %v112_v24 = vadd.f32 %v309_v22, %v111_v23  ;;  %v341_v25 = vpop.f32.mrb[1].mxu0 }
  0xe3   :  { %v115_v26 = vmax.f32 %v112_v24, 0.0 }
  0xe5   :  { %359 = vmatmul.mubr.msk.f32.vlgmr.msra.gmra.mrb[0].mxu1 %vm131_vm2, %v115_v26 }
 0x1b8   :  { %v201_v30 = vpop.f32.mrb[0].mxu1 }
 0x1b9   :  { %v202_v31 = vadd.f32 %v311_v29, %v201_v30  ;;  %v360_v32 = vpop.f32.mrb[1].mxu1 }
 0x1bb   :  { %v205_v33 = vmax.f32 %v202_v31, 0.0 }
 0x1bd   :  { %362 = vmatpush3.xpose.msk.msra.mxu0 %vm41_vm1, %v205_v33 }
 0x1c0   :  { %364 = vmatmul.mubr.msk.f32.vlgmr.msra.gmra.mrb[2].mxu0 %vm41_vm1, %v206_v34 }
 0x293   :  { %v289_v40 = vpop.f32.mrb[2].mxu0 }
 0x294   :  { %v290_v41 = vadd.f32 %v289_v40, %v216_v39  ;;  %v365_v42 = vpop.f32.mrb[3].mxu0 }
 0x296   :  { %294 = vst.msk [vmem:[#allocation3] sm:$0x1] %vm293_vm3, %v290_v41 }
 0x297   :  { %401 = shalt.err (!%p398_p4)
}
 0x298   :  { %s402_s6 = scalar_lea.hbm %s535_s7, 16 }
 0x299   :  { %p403_p5 = scmp.ne.s32.totalorder %s535_s7, %s402_s6  ;;  %p406_p6 = scmp.lt.u32.totalorder %s402_s6, %s535_s7 }
 0x29b   :  { %p408_p7 = pnand %p406_p6, %p403_p5 }
 0x29d   :  { %411 = shalt.err (!%p408_p7)
}
 0x29e   :  { %304 = dma.vmem_to_hbm [thread:$0]  %s302_s8, 16, %s535_s7, [#allocation4]  }
 0x29f   :  { %412 = dma.done.wait [#allocation4], 16  }
 0x2a0   :  { %413 = vsyncadd [#allocation4], 4294967280 }
 0x2a1   :  { %308 = vsyncpa [#allocation4], 1 }

</bundles_post_ra>
